<compile_context>
chip_gen: v5e
topology: v5e:2x2
jax: 0.10.0
libtpu: 0.0.40
codegen_flags: <defaults>
</compile_context>

<pallas_src>
import functools

import jax
import jax.numpy as jnp
from jax import lax
from jax.experimental import pallas as pl
from jax.experimental.pallas import tpu as pltpu


def _round_up(x: int, m: int) -> int:
    return ((x + m - 1) // m) * m


def _pick_tile(padded_dim: int, cap: int, unit: int = 128) -> int:
    """Largest multiple-of-`unit` divisor of `padded_dim` that is <= cap."""
    n = padded_dim // unit
    max_units = max(1, cap // unit)
    best = 1
    d = 1
    while d <= min(n, max_units):
        if n % d == 0:
            best = d
        d += 1
    return best * unit


@functools.lru_cache(maxsize=1)
def _tpu_hw_info():
    """Best-effort generation detection (VMEM budget + TensorCores per chip)."""
    vmem_cap = 48 * 1024 * 1024   # conservative default (v7x: 64 MiB per TC)
    num_tc = 1
    try:
        kind = jax.devices()[0].device_kind.lower()
    except Exception:
        kind = ""
    if "v5" in kind or "v6" in kind:
        vmem_cap = 96 * 1024 * 1024   # 128 MiB physical per (single) TC
        num_tc = 1
    elif "7" in kind:                  # v7x: 2 TCs share the chip
        vmem_cap = 48 * 1024 * 1024
        num_tc = 2
    return {"vmem_cap": vmem_cap, "num_tc": num_tc}


# --------------------------------------------------------------------------
# Kernels
# --------------------------------------------------------------------------
def _linear_kernel_out_acc(x_ref, wt_ref, b_ref, o_ref):
    # f32 output: the output block itself is the accumulator (its block index
    # is constant across the K grid axis, so it stays resident in VMEM).
    # x_ref:  [tile_b, tile_k]   (compute dtype)
    # wt_ref: [tile_k, tile_c]   (pre-transposed weight, MXU-native)
    # b_ref:  [1, tile_c]        (f32)
    # o_ref:  [tile_b, tile_c]   (f32)
    k = pl.program_id(2)

    @pl.when(k == 0)
    def _init():
        # Fold the bias add into the accumulator init.
        o_ref[...] = jnp.broadcast_to(b_ref[...], o_ref.shape)

    o_ref[...] += lax.dot_general(
        x_ref[...],
        wt_ref[...],
        dimension_numbers=(((1,), (0,)), ((), ())),
        preferred_element_type=jnp.float32,
    )


def _linear_kernel_scratch_acc(x_ref, wt_ref, b_ref, o_ref, acc_ref):
    # Narrow output dtypes (bf16 etc.): accumulate in an f32 scratch, cast once.
    k = pl.program_id(2)

    @pl.when(k == 0)
    def _init():
        acc_ref[...] = jnp.broadcast_to(
            b_ref[...].astype(jnp.float32), acc_ref.shape
        )

    acc_ref[...] += lax.dot_general(
        x_ref[...],
        wt_ref[...],
        dimension_numbers=(((1,), (0,)), ((), ())),
        preferred_element_type=jnp.float32,
    )

    @pl.when(k == pl.num_programs(2) - 1)
    def _store():
        o_ref[...] = acc_ref[...].astype(o_ref.dtype)


# --------------------------------------------------------------------------
# Wrapper over the padded / pre-transposed weight
# --------------------------------------------------------------------------
def _classification_head_padded(
    x, wt_pad, b_pad, *, num_classes, compute_dtype, out_dtype,
    tile_b=None, tile_b_cap=512, tile_k_cap=2048, tile_c_cap=512,
):
    """y = x @ W^T + b where wt_pad is the pre-transposed, 128-padded weight."""
    B, D = x.shape
    Dp, Cp = wt_pad.shape
    cd = jnp.dtype(compute_dtype)
    od = jnp.dtype(out_dtype)
    hw = _tpu_hw_info()

    # Sublane packing of the compute dtype (8 f32, 16 bf16, 32 for 8-bit).
    sub = 8 * max(1, 4 // cd.itemsize)

    # ---- B tiling: keep the last B tile nearly full --------------------
    if tile_b is None:
        n_b = max(1, -(-B // tile_b_cap))
        tile_b = _round_up(-(-B // n_b), sub)
    tile_b = max(sub, _round_up(tile_b, sub))
    tile_b = min(tile_b, _round_up(B, sub))
    padded_B = _round_up(B, tile_b)

    # ---- C / K tiling: multiple-of-128 divisors of the padded dims -----
    tile_c = _pick_tile(Cp, tile_c_cap)
    tile_k = _pick_tile(Dp, tile_k_cap)

    # ---- 2-TC chips (v7x): ensure >= 2 parallel grid blocks ------------
    if hw["num_tc"] >= 2 and (padded_B // tile_b) * (Cp // tile_c) < 2:
        if Cp // 128 >= 2:
            tile_c = _pick_tile(Cp, max(128, Cp // 2))
        elif tile_b >= 2 * sub:
            tile_b = _round_up(tile_b // 2, sub)
            padded_B = _round_up(B, tile_b)

    grid = (padded_B // tile_b, Cp // tile_c, Dp // tile_k)

    # ---- Per-call x prep (cast + pad only; weight already prepared) ----
    xp = x.astype(cd)
    if padded_B != B or Dp != D:
        xp = jnp.pad(xp, ((0, padded_B - B), (0, Dp - D)))

    # ---- Weight-streaming regime: deepen the weight pipeline -----------
    w_buffers = 2
    w_spec = pl.BlockSpec((tile_k, tile_c), lambda i, j, k: (k, j))
    if grid[0] == 1 and grid[2] > 1:
        try:
            w_spec = pl.BlockSpec(
                (tile_k, tile_c), lambda i, j, k: (k, j),
                pipeline_mode=pl.Buffered(3),
            )
            w_buffers = 3
        except (TypeError, AttributeError):
            pass  # older jax without pipeline_mode; default double buffer

    direct_out = od == jnp.dtype(jnp.float32)
    kernel = _linear_kernel_out_acc if direct_out else _linear_kernel_scratch_acc
    scratch = [] if direct_out else [pltpu.VMEM((tile_b, tile_c), jnp.float32)]

    # ---- VMEM budget ----------------------------------------------------
    vmem_bytes = (
        2 * tile_b * tile_k * cd.itemsize        # x tiles (double buffered)
        + w_buffers * tile_k * tile_c * cd.itemsize  # weight tiles
        + 2 * tile_b * tile_c * od.itemsize      # output tiles
        + 2 * tile_c * 4                         # bias tile
        + (0 if direct_out else tile_b * tile_c * 4)  # f32 accumulator
    )
    vmem_limit = int(min(max(2 * vmem_bytes, 32 * 1024 * 1024), hw["vmem_cap"]))

    cost = pl.CostEstimate(
        flops=2 * padded_B * Dp * Cp,
        transcendentals=0,
        bytes_accessed=(
            xp.size * cd.itemsize + wt_pad.size * cd.itemsize
            + b_pad.size * 4 + padded_B * Cp * od.itemsize
        ),
    )

    out = pl.pallas_call(
        kernel,
        out_shape=jax.ShapeDtypeStruct((padded_B, Cp), od),
        grid_spec=pltpu.PrefetchScalarGridSpec(
            num_scalar_prefetch=0,
            grid=grid,
            in_specs=[
                pl.BlockSpec((tile_b, tile_k), lambda i, j, k: (i, k)),  # x
                w_spec,                                                  # W^T
                pl.BlockSpec((1, tile_c), lambda i, j, k: (0, j)),       # bias
            ],
            out_specs=pl.BlockSpec((tile_b, tile_c), lambda i, j, k: (i, j)),
            scratch_shapes=scratch,
        ),
        compiler_params=pltpu.CompilerParams(
            dimension_semantics=("parallel", "parallel", "arbitrary"),
            vmem_limit_bytes=vmem_limit,
        ),
        cost_estimate=cost,
    )(xp, wt_pad, b_pad)

    # Slice away B / C padding.
    return out[:B, :num_classes]


# --------------------------------------------------------------------------
# Public API
# --------------------------------------------------------------------------
def prepare_classification_head(weight, bias, *, compute_dtype=jnp.bfloat16):
    """One-time layout prep: W [C, D] -> padded W^T [Dp, Cp]; bias -> [1, Cp] f32."""
    C, D = weight.shape
    Dp = _round_up(D, 128)
    Cp = _round_up(C, 128)
    wt = jnp.pad(weight.T.astype(compute_dtype), ((0, Dp - D), (0, Cp - C)))
    bp = jnp.pad(bias.astype(jnp.float32), ((0, Cp - C),)).reshape(1, Cp)
    return wt, bp


class PallasClassificationHead:
    """nn.Linear(input_dim, num_classes): weights prepared once, reused per call."""

    def __init__(self, weight, bias, *, compute_dtype=jnp.bfloat16, out_dtype=None):
        self.num_classes, self.input_dim = weight.shape
        self.compute_dtype = jnp.dtype(compute_dtype)
        self.out_dtype = jnp.dtype(out_dtype) if out_dtype is not None else None
        self.wt, self.bp = prepare_classification_head(
            weight, bias, compute_dtype=self.compute_dtype
        )

    def __call__(self, x):
        od = self.out_dtype if self.out_dtype is not None else x.dtype
        return _classification_head_padded(
            x, self.wt, self.bp,
            num_classes=self.num_classes,
            compute_dtype=self.compute_dtype,
            out_dtype=od,
        )


def classification_head(x, weight, bias, *, compute_dtype=jnp.bfloat16,
                        out_dtype=None):
    """One-shot convenience wrapper (prepares the weight on every call).

    For repeated use (the common case for a classification head), construct a
    PallasClassificationHead once so the transpose/pad of the full weight is
    not re-read from HBM each forward.
    """
    head = PallasClassificationHead(
        weight, bias, compute_dtype=compute_dtype, out_dtype=out_dtype
    )
    return head(x)


if __name__ == "__main__":
    # Small shapes consistent with the module: batch=8, input_dim=32, num_classes=8.
    # NOTE: for genuinely tiny problems like this a plain XLA matmul is at
    # least as fast; we run the Pallas kernel to exercise it.
    B, D, C = 8, 32, 8
    key = jax.random.PRNGKey(0)
    kx, kw, kb = jax.random.split(key, 3)

    x = jax.random.normal(kx, (B, D), dtype=jnp.float32)
    bound = 1.0 / (D ** 0.5)
    weight = jax.random.uniform(kw, (C, D), minval=-bound, maxval=bound,
                                dtype=jnp.float32)
    bias = jax.random.uniform(kb, (C,), minval=-bound, maxval=bound,
                              dtype=jnp.float32)

    y_ref = x @ weight.T + bias

    # Default path: bf16 weight/activation streaming, f32 accumulation.
    head = PallasClassificationHead(weight, bias)           # prep once
    fwd = jax.jit(lambda xx: head(xx))
    y = jax.block_until_ready(fwd(x))
    assert y.shape == (B, C)
    assert jnp.allclose(y, y_ref, atol=2e-2, rtol=2e-2), "bf16 path mismatch"

    # Explicit f32 opt-in: bit-for-bit close to the reference.
    head32 = PallasClassificationHead(weight, bias, compute_dtype=jnp.float32)
    y32 = jax.block_until_ready(jax.jit(lambda xx: head32(xx))(x))
    assert jnp.allclose(y32, y_ref, atol=1e-5, rtol=1e-5), "f32 path mismatch"

    print("KERNEL_OK")
</pallas_src>

<mosaic_0001>
module attributes {stable_mosaic.version = 11 : i64} {
  func.func @_linear_kernel_out_acc(%arg0: i32, %arg1: i32, %arg2: i32, %arg3: memref<16x128xbf16, #tpu.memory_space<vmem>>, %arg4: memref<128x128xbf16, #tpu.memory_space<vmem>>, %arg5: memref<1x128xf32, #tpu.memory_space<vmem>>, %arg6: memref<16x128xf32, #tpu.memory_space<vmem>>) attributes {dimension_semantics = [#tpu.dimension_semantics<parallel>, #tpu.dimension_semantics<parallel>, #tpu.dimension_semantics<arbitrary>], iteration_bounds = array<i64: 1, 1, 1>, scalar_prefetch = 0 : i64, scratch_operands = 0 : i64, tpu.core_type = #tpu.core_type<tc>, window_params = [{transform_indices = @transform_0, window_bounds = array<i64: 16, 128>}, {transform_indices = @transform_1, window_bounds = array<i64: 128, 128>}, {transform_indices = @transform_2, window_bounds = array<i64: 1, 128>}, {transform_indices = @transform_3, window_bounds = array<i64: 16, 128>}]} {
    %c0_i32 = arith.constant 0 : i32
    %0 = arith.cmpi eq, %arg2, %c0_i32 : i32
    %1 = arith.extui %0 : i1 to i32
    %c0_i32_0 = arith.constant 0 : i32
    %2 = arith.cmpi ne, %1, %c0_i32_0 : i32
    scf.if %2 {
      %c0_8 = arith.constant 0 : index
      %c0_9 = arith.constant 0 : index
      %9 = vector.load %arg5[%c0_8, %c0_9] : memref<1x128xf32, #tpu.memory_space<vmem>>, vector<1x128xf32>
      %10 = vector.shape_cast %9 : vector<1x128xf32> to vector<1x128xf32>
      %11 = vector.broadcast %10 : vector<1x128xf32> to vector<16x128xf32>
      %c0_10 = arith.constant 0 : index
      %c0_11 = arith.constant 0 : index
      %12 = vector.load %arg6[%c0_10, %c0_11] : memref<16x128xf32, #tpu.memory_space<vmem>>, vector<16x128xf32>
      tpu.vector_store %arg6[%c0_10, %c0_11], %11 {strides = array<i32>} : memref<16x128xf32, #tpu.memory_space<vmem>>, vector<16x128xf32>,
    } else {
    }
    %c0 = arith.constant 0 : index
    %c0_1 = arith.constant 0 : index
    %3 = vector.load %arg6[%c0, %c0_1] : memref<16x128xf32, #tpu.memory_space<vmem>>, vector<16x128xf32>
    %c0_2 = arith.constant 0 : index
    %c0_3 = arith.constant 0 : index
    %4 = vector.load %arg3[%c0_2, %c0_3] : memref<16x128xbf16, #tpu.memory_space<vmem>>, vector<16x128xbf16>
    %c0_4 = arith.constant 0 : index
    %c0_5 = arith.constant 0 : index
    %5 = vector.load %arg4[%c0_4, %c0_5] : memref<128x128xbf16, #tpu.memory_space<vmem>>, vector<128x128xbf16>
    %cst = arith.constant dense<0.000000e+00> : vector<16x128xf32>
    %6 = tpu.matmul %4, %5, %cst {dimension_numbers = #tpu.dot_dimension_numbers<[1], [0], [0], [1], [0, 0, 1, 1], [], []>} : vector<16x128xbf16>, vector<128x128xbf16>, vector<16x128xf32> -> vector<16x128xf32>
    %7 = arith.addf %3, %6 : vector<16x128xf32>
    %c0_6 = arith.constant 0 : index
    %c0_7 = arith.constant 0 : index
    %8 = vector.load %arg6[%c0_6, %c0_7] : memref<16x128xf32, #tpu.memory_space<vmem>>, vector<16x128xf32>
    tpu.vector_store %arg6[%c0_6, %c0_7], %7 {strides = array<i32>} : memref<16x128xf32, #tpu.memory_space<vmem>>, vector<16x128xf32>,
    return
  }
  func.func @transform_0(%arg0: i32, %arg1: i32, %arg2: i32) -> (i32, i32) {
    %c0_i32 = arith.constant 0 : i32
    return %arg0, %arg2 : i32, i32
  }
  func.func @transform_1(%arg0: i32, %arg1: i32, %arg2: i32) -> (i32, i32) {
    %c0_i32 = arith.constant 0 : i32
    return %arg2, %arg1 : i32, i32
  }
  func.func @transform_2(%arg0: i32, %arg1: i32, %arg2: i32) -> (i32, i32) {
    %c0_i32 = arith.constant 0 : i32
    %c0_i32_0 = arith.constant 0 : i32
    return %c0_i32, %arg1 : i32, i32
  }
  func.func @transform_3(%arg0: i32, %arg1: i32, %arg2: i32) -> (i32, i32) {
    %c0_i32 = arith.constant 0 : i32
    return %arg0, %arg1 : i32, i32
  }
}

</mosaic_0001>

<bundles_post_ra>
// kernel: _lambda_.1
= control target key start
LH: loop header
LB: loop body
LE: loop exit
PB: predicated region body
PF: predicated region fallthrough
CT: control target
= control target key end

     0   :  { %8 = vsyncpa [#allocation3], 0  ;;  %s212_s15 = smov [#allocation2]   ;;  %s213_s17 = smov 64   ;;  %s250_s0 = inlined_call_operand.vmem [shape: bf16[16,128], index: 0, kind: input, shape index: {}]   ;;  %s251_s1 = inlined_call_operand.hbm [shape: bf16[128,128], index: 1, kind: input, shape index: {}]   ;;  %s252_s2 = inlined_call_operand.vmem [shape: f32[1,128], index: 2, kind: input, shape index: {}]   ;;  %s253_s3 = inlined_call_operand.vmem [shape: f32[16,128], index: 3, kind: output, shape index: {}]  }
   0x1   :  { %s15_s14 = sshll.u32 %s251_s1, 4  ;;  %s17_s16 = sshll.u32 %s212_s15, 4  ;;  %s16_s14 = int_to_ptr.hbm [resolvable:$true] %s15_s14  ;;  %s18_s16 = int_to_ptr.vmem [resolvable:$true] %s17_s16 }
   0x2   :  { %s214_s18 = smov 4  }
   0x3   :  { %23 = dma.hbm_to_vmem [thread:$0]  %s16_s14, 1024, %s18_s16, [#allocation3], %s213_s17, %s213_s17, %s214_s18  }
   0x4   :  { %210 = dma.done.wait [#allocation3], 1024  }
   0x5   :  { %211 = vsyncadd [#allocation3], 4294966272  ;;  %v181_v0 = vld [vmem:[#allocation2 + $0x38] sm:$0xff]  ;;  %v180_v1 = vld [vmem:[#allocation2 + $0x30] sm:$0xff] }
   0x6   :  { %114 = vmatpush.bf16.msra.mxu0 %v181_v0  ;;  %v179_v2 = vld [vmem:[#allocation2 + $0x28] sm:$0xff]  ;;  %v178_v3 = vld [vmem:[#allocation2 + $0x20] sm:$0xff]  ;;  %v177_v4 = vld [vmem:[#allocation2 + $0x18] sm:$0xff] }
   0x7   :  { %v176_v5 = vld [vmem:[#allocation2 + $0x10] sm:$0xff]  ;;  %v175_v6 = vld [vmem:[#allocation2 + $0x8] sm:$0xff]  ;;  %v174_v7 = vld [vmem:[#allocation2] sm:$0xff] }
   0x8   :  { %v173_v8 = vld [vmem:[%s250_s0] sm:$0xff] }
   0x9   :  { %v185_v9 = vld [vmem:[%s252_s2] ss:$0 sm:$0xff] }
   0xa   :  { %115 = vmatpush.bf16.msra.mxu0 %v180_v1 }
   0xe   :  { %116 = vmatpush.bf16.msra.mxu0 %v179_v2 }
  0x12   :  { %117 = vmatpush.bf16.msra.mxu0 %v178_v3 }
  0x16   :  { %118 = vmatpush.bf16.msra.mxu0 %v177_v4 }
  0x1a   :  { %119 = vmatpush.bf16.msra.mxu0 %v176_v5 }
  0x1e   :  { %120 = vmatpush.bf16.msra.mxu0 %v175_v6 }
  0x22   :  { %121 = vmatpush.bf16.msra.mxu0 %v174_v7 }
  0x25   :  { %122 = vmatmul.bf16.vlgmr.msra.gmra.mxu0 %v173_v8 }
  0xa2   :  { %v123_v10 = vpop.f32.mrf.mxu0 }
  0xa3   :  { %v128_v11 = vadd.f32 %v185_v9, %v123_v10 }
  0xa5   :  { %130 = vst [vmem:[%s253_s3] sm:$0xff] %v128_v11 }
  0xaa   :  { %v125_v12 = vpop.f32.mrf.mxu0 }
  0xab   :  { %v129_v13 = vadd.f32 %v185_v9, %v125_v12 }
  0xad   :  { %131 = vst [vmem:[%s253_s3 + $0x8] sm:$0xff] %v129_v13 }
  0xae   :  { %136 = vsyncpa [#allocation3], 1 }

</bundles_post_ra>
